<compile_context>
chip_gen: v7x
topology: tpu7x:2x2x1
jax: 0.10.0
libtpu: 0.0.40
codegen_flags: <defaults>
</compile_context>

<pallas_src>
import math

import jax
import jax.numpy as jnp
from jax.experimental import pallas as pl
from jax.experimental.pallas import tpu as pltpu


def _round_up(x, m):
    return ((x + m - 1) // m) * m


def _conv_mm_kernel(x_ref, w_ref, b_ref, o_ref):
    # x_ref: (P_TILE, K)   w_ref: (K, Cout_p)   b_ref: (1, Cout_p)
    # o_ref: (P_TILE, Cout_p)
    acc = jnp.dot(x_ref[...], w_ref[...], preferred_element_type=jnp.float32)
    o_ref[...] = (acc + b_ref[...].astype(jnp.float32)).astype(o_ref.dtype)


def _choose_p_tile(P, K, cout_p, itemsize, max_tile=1024, target_bytes=2 << 20):
    """Pick a spatial tile (multiple of 8) so x-tile + out-tile ~ a few MiB."""
    per_row = (K + cout_p) * max(itemsize, 4)
    t = max(8, min(max_tile, target_bytes // per_row))
    t = max(8, (t // 8) * 8)
    p8 = _round_up(P, 8)
    return min(t, p8)


def downsample_forward(x_nchw, weight_oihw, bias, *, stride=2, pad=1,
                       compute_dtype=None, p_tile=None):
    """Equivalent of Downsample.forward (Conv2d k=3, stride=2, padding=1)."""
    N, Cin, H, W = x_nchw.shape
    Cout, Cin_w, KH, KW = weight_oihw.shape
    assert Cin == Cin_w, "input channel mismatch (mirrors the torch assert)"
    Ho = (H + 2 * pad - KH) // stride + 1
    Wo = (W + 2 * pad - KW) // stride + 1
    P = Ho * Wo
    K = KH * KW * Cin

    out_dtype = x_nchw.dtype
    cdtype = out_dtype if compute_dtype is None else compute_dtype

    # ---- glue (plain JAX): im2col in channels-last layout ----
    x_nhwc = jnp.transpose(x_nchw, (0, 2, 3, 1)).astype(cdtype)
    xp = jnp.pad(x_nhwc, ((0, 0), (pad, pad), (pad, pad), (0, 0)))
    cols = []
    for ky in range(KH):
        for kx in range(KW):
            cols.append(
                xp[:, ky: ky + stride * Ho: stride, kx: kx + stride * Wo: stride, :]
            )
    x_cols = jnp.concatenate(cols, axis=-1).reshape(N, P, K)
    # TODO(synk): im2col extraction (pad + 9 strided slices) is still JAX glue;
    # an in-kernel row-block gather from a pl.ANY input would cut HBM traffic
    # a further ~2-3x.

    # Weight in matching (ky, kx, cin) -> cout order; lane-dense pad of Cout.
    w_col = jnp.transpose(weight_oihw, (2, 3, 1, 0)).reshape(K, Cout).astype(cdtype)
    cout_p = _round_up(Cout, 128)
    b2d = bias.astype(jnp.float32).reshape(1, Cout)
    if cout_p != Cout:
        w_col = jnp.pad(w_col, ((0, 0), (0, cout_p - Cout)))
        b2d = jnp.pad(b2d, ((0, 0), (0, cout_p - Cout)))

    # Spatial tiling of the flattened output positions.
    itemsize = jnp.dtype(cdtype).itemsize
    P_TILE = p_tile if p_tile is not None else _choose_p_tile(P, K, cout_p, itemsize)
    P_pad = _round_up(P, P_TILE)
    if P_pad != P:
        x_cols = jnp.pad(x_cols, ((0, 0), (0, P_pad - P), (0, 0)))

    grid = (N, P_pad // P_TILE)
    flops = 2 * N * P_pad * K * cout_p
    bytes_accessed = (
        N * P_pad * K * itemsize
        + K * cout_p * itemsize
        + cout_p * 4
        + N * P_pad * cout_p * jnp.dtype(out_dtype).itemsize
    )

    out = pl.pallas_call(
        _conv_mm_kernel,
        out_shape=jax.ShapeDtypeStruct((N, P_pad, cout_p), out_dtype),
        grid_spec=pltpu.PrefetchScalarGridSpec(
            num_scalar_prefetch=0,
            grid=grid,
            in_specs=[
                pl.BlockSpec((pl.Squeezed(), P_TILE, K), lambda n, p: (n, p, 0)),
                pl.BlockSpec((K, cout_p), lambda n, p: (0, 0)),
                pl.BlockSpec((1, cout_p), lambda n, p: (0, 0)),
            ],
            out_specs=pl.BlockSpec(
                (pl.Squeezed(), P_TILE, cout_p), lambda n, p: (n, p, 0)
            ),
        ),
        compiler_params=pltpu.CompilerParams(
            dimension_semantics=("parallel", "parallel"),
        ),
        cost_estimate=pl.CostEstimate(
            flops=flops, transcendentals=0, bytes_accessed=bytes_accessed
        ),
    )(x_cols, w_col, b2d)

    out = out[:, :P, :Cout].reshape(N, Ho, Wo, Cout)
    return jnp.transpose(out, (0, 3, 1, 2)).astype(out_dtype)


def init_downsample_params(key, channels, out_channels=None):
    """Deterministic Conv2d(k=3) param init (PyTorch-style uniform bounds)."""
    out_channels = channels if out_channels is None else out_channels
    kw, kb = jax.random.split(key)
    fan_in = channels * 3 * 3
    bound = 1.0 / math.sqrt(fan_in)
    weight = jax.random.uniform(
        kw, (out_channels, channels, 3, 3), jnp.float32, -bound, bound
    )
    bias = jax.random.uniform(kb, (out_channels,), jnp.float32, -bound, bound)
    return weight, bias


if __name__ == "__main__":
    key = jax.random.PRNGKey(0)
    kx, kp = jax.random.split(key)

    N, C, H, W = 2, 4, 16, 16
    out_channels = 8

    x = jax.random.normal(kx, (N, C, H, W), dtype=jnp.float32)
    weight, bias = init_downsample_params(kp, C, out_channels)

    y = downsample_forward(x, weight, bias)
    y = jax.block_until_ready(y)

    # Pure-JAX reference (same semantics as nn.Conv2d(k=3, stride=2, padding=1)).
    y_ref = jax.lax.conv_general_dilated(
        x,
        weight,
        window_strides=(2, 2),
        padding=((1, 1), (1, 1)),
        dimension_numbers=("NCHW", "OIHW", "NCHW"),
    ) + bias.reshape(1, -1, 1, 1)

    assert y.shape == (N, out_channels, H // 2, W // 2), y.shape
    assert jnp.allclose(y, y_ref, atol=1e-5, rtol=1e-5), "mismatch vs reference conv"

    print("KERNEL_OK")
</pallas_src>

<mosaic_0001>
module attributes {stable_mosaic.version = 11 : i64} {
  func.func @_conv_mm_kernel(%arg0: i32, %arg1: i32, %arg2: memref<1x64x36xf32, #tpu.memory_space<vmem>>, %arg3: memref<36x128xf32, #tpu.memory_space<vmem>>, %arg4: memref<1x128xf32, #tpu.memory_space<vmem>>, %arg5: memref<1x64x128xf32, #tpu.memory_space<vmem>>) attributes {dimension_semantics = [#tpu.dimension_semantics<parallel>, #tpu.dimension_semantics<parallel>], iteration_bounds = array<i64: 2, 1>, scalar_prefetch = 0 : i64, scratch_operands = 0 : i64, tpu.core_type = #tpu.core_type<tc>, window_params = [{transform_indices = @transform_0, window_bounds = array<i64: 1, 64, 36>}, {pipeline_mode = #tpu.pipeline_mode<synchronous>, transform_indices = @transform_1, window_bounds = array<i64: 36, 128>}, {pipeline_mode = #tpu.pipeline_mode<synchronous>, transform_indices = @transform_2, window_bounds = array<i64: 1, 128>}, {transform_indices = @transform_3, window_bounds = array<i64: 1, 64, 128>}]} {
    %c0 = arith.constant 0 : index
    %c0_0 = arith.constant 0 : index
    %c0_1 = arith.constant 0 : index
    %0 = vector.load %arg2[%c0, %c0_0, %c0_1] : memref<1x64x36xf32, #tpu.memory_space<vmem>>, vector<1x64x36xf32>
    %1 = vector.shape_cast %0 : vector<1x64x36xf32> to vector<64x36xf32>
    %c0_2 = arith.constant 0 : index
    %c0_3 = arith.constant 0 : index
    %2 = vector.load %arg3[%c0_2, %c0_3] : memref<36x128xf32, #tpu.memory_space<vmem>>, vector<36x128xf32>
    %cst = arith.constant dense<0.000000e+00> : vector<64x128xf32>
    %3 = tpu.matmul %1, %2, %cst {dimension_numbers = #tpu.dot_dimension_numbers<[1], [0], [0], [1], [0, 0, 1, 1], [], []>} : vector<64x36xf32>, vector<36x128xf32>, vector<64x128xf32> -> vector<64x128xf32>
    %c0_4 = arith.constant 0 : index
    %c0_5 = arith.constant 0 : index
    %4 = vector.load %arg4[%c0_4, %c0_5] : memref<1x128xf32, #tpu.memory_space<vmem>>, vector<1x128xf32>
    %5 = vector.broadcast %4 : vector<1x128xf32> to vector<64x128xf32>
    %6 = arith.addf %3, %5 : vector<64x128xf32>
    %c0_6 = arith.constant 0 : index
    %c0_7 = arith.constant 0 : index
    %c0_8 = arith.constant 0 : index
    %7 = vector.load %arg5[%c0_6, %c0_7, %c0_8] : memref<1x64x128xf32, #tpu.memory_space<vmem>>, vector<1x64x128xf32>
    %8 = vector.shape_cast %7 : vector<1x64x128xf32> to vector<64x128xf32>
    %9 = vector.shape_cast %6 : vector<64x128xf32> to vector<1x64x128xf32>
    tpu.vector_store %arg5[%c0_6, %c0_7, %c0_8], %9 {strides = array<i32>} : memref<1x64x128xf32, #tpu.memory_space<vmem>>, vector<1x64x128xf32>,
    return
  }
  func.func @transform_0(%arg0: i32, %arg1: i32) -> (i32, i32, i32) {
    %c0_i32 = arith.constant 0 : i32
    %c0_i32_0 = arith.constant 0 : i32
    return %arg0, %arg1, %c0_i32 : i32, i32, i32
  }
  func.func @transform_1(%arg0: i32, %arg1: i32) -> (i32, i32) {
    %c0_i32 = arith.constant 0 : i32
    %c0_i32_0 = arith.constant 0 : i32
    %c0_i32_1 = arith.constant 0 : i32
    return %c0_i32, %c0_i32_0 : i32, i32
  }
  func.func @transform_2(%arg0: i32, %arg1: i32) -> (i32, i32) {
    %c0_i32 = arith.constant 0 : i32
    %c0_i32_0 = arith.constant 0 : i32
    %c0_i32_1 = arith.constant 0 : i32
    return %c0_i32, %c0_i32_0 : i32, i32
  }
  func.func @transform_3(%arg0: i32, %arg1: i32) -> (i32, i32, i32) {
    %c0_i32 = arith.constant 0 : i32
    %c0_i32_0 = arith.constant 0 : i32
    return %arg0, %arg1, %c0_i32 : i32, i32, i32
  }
}

</mosaic_0001>

<bundles_post_ra>
// kernel: tpu_custom_call.1
= control target key start
LH: loop header
LB: loop body
LE: loop exit
PB: predicated region body
PF: predicated region fallthrough
CT: control target
= control target key end

     0   :  { %8 = vsyncpa [#allocation3], 0  ;;  %s836_s0 = inlined_call_operand.vmem [shape: f32[2,64,36], index: 0, kind: input, shape index: {}]   ;;  %s837_s1 = inlined_call_operand.vmem [shape: f32[36,128], index: 1, kind: input, shape index: {}]   ;;  %s838_s2 = inlined_call_operand.vmem [shape: f32[1,128], index: 2, kind: input, shape index: {}]   ;;  %s839_s3 = inlined_call_operand.hbm [shape: f32[2,64,128], index: 3, kind: output, shape index: {}]  }
   0x1   :  { %10 = vsyncpa [#allocation3 + $0x1], 0  ;;  %s691_s12 = smov 0   ;;  %s693_s13 = smov 0  }
   0x2   :  { %s695_s14 = smov 0   ;;  %s697_s15 = smov 0  }
   0x3   :  { %s699_s16 = smov 0   ;;  %s701_s17 = smov 0  }
   0x4 LB: > { %s457_s18 = sadd.s32 4294967295, %s666_s17   ;;  %s458_s19 = sadd.s32 4294967294, %s666_s17   ;;  %s666_s17 = sphi %s701_s17, %s16_s17   ;;  %s662_s16 = sphi %s699_s16, %s846_s16   ;;  %s658_s15 = sphi %s697_s15, %s845_s15   ;;  %s654_s14 = sphi %s695_s14, %s844_s14   ;;  %s650_s13 = sphi %s693_s13, %s843_s13   ;;  %s646_s12 = sphi %s691_s12, %s842_s12  }
   0x5   : > { %s28_s20 = sadd.s32 1, %s662_s16  ;;  %s107_s21 = sadd.s32 1, %s654_s14 }
   0x6   : > { %p30_p0 = scmp.ge.s32.totalorder %s28_s20, 2  ;;  %p117_p1 = scmp.ne.s32.totalorder %s654_s14, %s650_s13 }
   0x7   : > { %p118_p2 = scmp.eq.s32.totalorder %s457_s18, 1  ;;  %p123_p3 = scmp.ne.s32.totalorder %s650_s13, %s646_s12 }
   0x8   : > { %s848_s20 = smov (%p30_p0, %s28_s20), 0  ;;  %p124_p5 = scmp.eq.s32.totalorder %s458_s19, 1 }
   0x9   : > { %p731_p4 = por %p118_p2, %p117_p1  ;;  %s102_s23 = ssub.s32 %s662_s16, %s848_s20 }
   0xa   : > { %p461_p6 = scmp.ge.s32.totalorder %s666_s17, 1  ;;  %p105_p7 = scmp.eq.s32.totalorder %s102_s23, 0 }
   0xb   : > { %p738_p8 = por %p124_p5, %p123_p3  ;;  %p161_p9 = scmp.lt.s32.totalorder %s666_s17, 3 }
   0xc   : > { %s744_s25 = scalar_select %p105_p7, %s654_s14, %s107_s21  }
   0xd   : > { %p162_p10 = pnand %p461_p6, %p161_p9 }
   0xe   : > { %v208_v0 = vld [vmem:[%s837_s1] sm:$0xff] (!%p162_p10)  ;;  %v209_v1 = vld [vmem:[%s837_s1 + $0x8] sm:$0xff] (!%p162_p10)  ;;  %v210_v2 = vld [vmem:[%s837_s1 + $0x10] sm:$0xff] (!%p162_p10)  ;;  %p190_p11 = scmp.lt.s32.totalorder (!%p162_p10), %s658_s15, 1  ;;  %vm220_vm0 = vcmask (!%p162_p10), 293888   ;;  %vm245_vm1 = vcmask (!%p162_p10), 1043456  }
   0xf   : > { %165 = sbr.rel (%p162_p10) target bundleno = 263 (0x107), region = 32  ;;  %v517_v3 = vpack.c.bf16 (!%p162_p10), %v209_v1, %v208_v0  ;;  %v211_v4 = vld [vmem:[%s837_s1 + $0x18] sm:$0xff] (!%p162_p10)  ;;  %v212_v6 = vld [vmem:[%s837_s1 + $0x20] sm:$0xf] (!%p162_p10)  ;;  %s186_s21 = sand.u32 (!%p162_p10), 1, %s650_s13  }
  0x10   : > { %v521_v5 = vpack.c.bf16 (!%p162_p10), %v211_v4, %v210_v2  ;;  %s462_s23 = sshll.u32 (!%p162_p10), %s186_s21, 6  ;;  %v465_v15 = vld [vmem:[%s838_s2] ss:$0 sm:$0xff] (!%p162_p10)  ;;  %s481_s28 = sshll.u32 (!%p162_p10), %s658_s15, 10 }
  0x11   : > { %518 = vmatprep.subr.bf16.mxu0 (!%p162_p10), %v517_v3  ;;  %525 = vmatprep.subr.bf16.mxu1 (!%p162_p10), %v517_v3  ;;  %s188_s29 = scalar_lea.vmem (!%p162_p10), [#allocation2], %s462_s23  ;;  %s784_s6 = scalar_lea.hbm (!%p162_p10), %s839_s3, %s481_s28 }
  0x12   : > { %520 = vmatpush3.bf16.msra.mxu0 (!%p162_p10), %v517_v3  ;;  %528 = vmatpush3.bf16.msra.mxu1 (!%p162_p10), %v517_v3  ;;  %s378_s30 = sshll.u32 (!%p162_p10), %s188_s29, 4  ;;  %s786_s30 = int_to_ptr.vmem [resolvable:$true] %s378_s30 }
  0x13   : > { %522 = vmatprep.subr.bf16.mxu0 (!%p162_p10), %v521_v5  ;;  %526 = vmatprep.subr.bf16.mxu1 (!%p162_p10), %v521_v5 }
  0x16   : > { %s191_s7 = scalar_select %p190_p11, %s658_s15, 1  ;;  %524 = vmatpush3.bf16.msra.mxu0 %v521_v5  ;;  %529 = vmatpush3.bf16.msra.mxu1 %v521_v5 }
  0x17   : > { %503 = vmatprep.subr.msk.mxu0 %vm245_vm1, %v212_v6  ;;  %527 = vmatprep.subr.msk.mxu1 %vm245_vm1, %v212_v6  ;;  %s790_s15 = scalar_lea.sflag [#allocation3], %s186_s21 }
  0x18   : > { %s480_s8 = sshll.u32 %s191_s7, 6  ;;  %s588_s7 = scalar_lea.vmem %s786_s30, 1024 }
  0x19   : > { %s197_s11 = scalar_lea.vmem %s836_s0, %s480_s8  ;;  %p589_p12 = scmp.ne.s32.totalorder %s786_s30, %s588_s7 }
  0x1a   : > { %v200_v7 = vld [vmem:[%s197_s11] sm:$0xff]  ;;  %v201_v9 = vld [vmem:[%s197_s11 + $0x8] sm:$0xff]  ;;  %v202_v11 = vld [vmem:[%s197_s11 + $0x10] sm:$0xff]  ;;  %504 = vmatpush3.msk.msra.mxu0 %vm245_vm1, %v212_v6  ;;  %530 = vmatpush3.msk.msra.mxu1 %vm245_vm1, %v212_v6  ;;  %s668_s8 = smov [#allocation2]  }
  0x1b   : > { %v204_v8 = vld [vmem:[%s197_s11 + $0x20] sm:$0xff]  ;;  %505 = vmatprep.mubr.msk.f32.mxu0 %vm220_vm0, %v200_v7  ;;  %v205_v10 = vld [vmem:[%s197_s11 + $0x28] sm:$0xff]  ;;  %v206_v12 = vld [vmem:[%s197_s11 + $0x30] sm:$0xff]  ;;  %p590_p13 = pnand %p589_p12, %p731_p4  ;;  %s592_s9 = sshll.u32 %s668_s8, 4  ;;  %s593_s9 = int_to_ptr.vmem [resolvable:$false] %s592_s9 }
  0x1c   : > { %511 = vmatprep.mubr.msk.f32.mxu1 %vm220_vm0, %v204_v8  ;;  %506 = vmatmul.mubr.msk.f32.vlgmr.msra.gmra.mrb[0].mxu0 %vm220_vm0, %v201_v9  ;;  %v203_v13 = vld [vmem:[%s197_s11 + $0x18] sm:$0xff]  ;;  %s594_s10 = scalar_lea.vmem %s593_s9, 2048  ;;  %p595_p1 = scmp.lt.s32.totalorder %s786_s30, %s593_s9 }
  0x1d   : > { %512 = vmatmul.mubr.msk.f32.vlgmr.msra.gmra.mrb[0].mxu1 %vm220_vm0, %v205_v10  ;;  %508 = vmatprep.mubr.msk.f32.mxu0 %vm220_vm0, %v202_v11  ;;  %v207_v14 = vld [vmem:[%s197_s11 + $0x38] sm:$0xff]  ;;  %p591_p0 = pneg %p590_p13  ;;  %p596_p2 = scmp.lt.s32.totalorder %s594_s10, %s588_s7 }
  0x1e   : > { %514 = vmatprep.mubr.msk.f32.mxu1 %vm220_vm0, %v206_v12 }
  0x1f   : > { %p597_p3 = por %p596_p2, %p595_p1 }
  0x20   : > { %509 = vmatmul.mubr.msk.f32.gmra.mrb[2].mxu0 %vm220_vm0, %v203_v13 }
  0x21   : > { %515 = vmatmul.mubr.msk.f32.gmra.mrb[2].mxu1 %vm220_vm0, %v207_v14  ;;  %p598_p5 = pnand %p597_p3, %p591_p0 }
  0xef   : > { %v507_v16 = vpop.f32.mrb[0].mxu0 }
  0xf0   : > { %v513_v17 = vpop.f32.mrb[0].mxu1  ;;  %v321_v18 = vadd.f32 %v507_v16, %v465_v15  ;;  %v315_v20 = vpop.f32.mrb[1].mxu0 }
  0xf1   : > { %v341_v19 = vadd.f32 %v513_v17, %v465_v15  ;;  %v335_v21 = vpop.f32.mrb[1].mxu1  ;;  %v316_v22 = vadd.f32 %v465_v15, %v315_v20 }
  0xf2   : > { %v336_v23 = vadd.f32 %v465_v15, %v335_v21  ;;  %355 = vst [vmem:[%s188_s29 + $0x8] sm:$0xff] %v321_v18 }
  0xf3   : > { %359 = vst [vmem:[%s188_s29 + $0x28] sm:$0xff] %v341_v19  ;;  %354 = vst [vmem:[%s188_s29] sm:$0xff] %v316_v22  ;;  %v510_v24 = vpop.f32.mrb[2].mxu0 }
  0xf4   : > { %358 = vst [vmem:[%s188_s29 + $0x20] sm:$0xff] %v336_v23  ;;  %v516_v25 = vpop.f32.mrb[2].mxu1  ;;  %v331_v26 = vadd.f32 %v510_v24, %v465_v15  ;;  %v325_v28 = vpop.f32.mrb[3].mxu0 }
  0xf5   : > { %v351_v27 = vadd.f32 %v516_v25, %v465_v15  ;;  %v345_v29 = vpop.f32.mrb[3].mxu1  ;;  %v326_v30 = vadd.f32 %v465_v15, %v325_v28 }
  0xf6   : > { %v346_v31 = vadd.f32 %v465_v15, %v345_v29  ;;  %357 = vst [vmem:[%s188_s29 + $0x18] sm:$0xff] %v331_v26 }
  0xf7   : > { %361 = vst [vmem:[%s188_s29 + $0x38] sm:$0xff] %v351_v27  ;;  %356 = vst [vmem:[%s188_s29 + $0x10] sm:$0xff] %v326_v30 }
  0xf8   : > { %360 = vst [vmem:[%s188_s29 + $0x30] sm:$0xff] %v346_v31 }
  0xf9   : > { %601 = shalt.err (!%p598_p5)
}
  0xfa   : > { %s602_s11 = scalar_lea.hbm %s784_s6, 1024  ;;  %s606_s21 = scalar_lea.hbm %s839_s3, 2048 }
  0xfb   : > { %p603_p6 = scmp.ne.s32.totalorder %s784_s6, %s602_s11  ;;  %p607_p10 = scmp.lt.u32.totalorder %s784_s6, %s839_s3 }
  0xfc   : > { %p608_p11 = scmp.lt.u32.totalorder %s606_s21, %s602_s11  ;;  %p610_p13 = scmp.lt.u32.totalorder %s602_s11, %s784_s6 }
  0xfd   : > { %p604_p7 = pnand %p603_p6, %p731_p4 }
  0xfe   : > { %p609_p12 = por %p608_p11, %p607_p10 }
  0xff   : > { %p605_p9 = pneg %p604_p7 }
 0x100   : > { %p611_p0 = por %p610_p13, %p609_p12 }
 0x102   : > { %p612_p1 = pnand %p611_p0, %p605_p9 }
 0x104   : > { %615 = shalt.err (!%p612_p1)
}
 0x105   : > { %s669_s27 = smov 128   ;;  %s670_s28 = smov 8  }
 0x106   : > { %531 = dma.vmem_to_hbm [thread:$0]  (%p731_p4), %s786_s30, 1024, %s784_s6, %s790_s15, %s669_s27, %s669_s27, %s670_s28  }
 0x107 PF: > { %p537_p2 = scmp.ge.s32.totalorder %s666_s17, 2  ;;  %s393_s29 = sand.u32 1, %s646_s12  }
 0x108   : > { %s394_s4 = scalar_lea.sflag [#allocation3], %s393_s29 }
 0x109   : > { %p534_p3 = pnand %p537_p2, %p738_p8 }
 0x10b   : > { %641 = dma.done.wait (!%p534_p3), %s394_s4, 1024  }
 0x10c   : > { %643 = vsyncadd (!%p534_p3), %s394_s4, 4294966272  ;;  %s16_s17 = sadd.s32 1, %s666_s17   ;;  %s842_s12 = smov %s650_s13 }
 0x10d   : > { %p13_p5 = scmp.ge.s32.totalorder %s16_s17, 4   ;;  %s843_s13 = smov %s654_s14 }
 0x10e   : > { %s844_s14 = smov %s744_s25  ;;  %s845_s15 = smov %s662_s16 }
 0x10f   : > { %s846_s16 = smov %s848_s20  ;;  %15 = sbr.rel (!%p13_p5) target bundleno = 4 (0x4), region = 67 }
 0x116   :  { %399 = vsyncpa [#allocation3], 1 }
 0x117   :  { %401 = vsyncpa [#allocation3 + $0x1], 1 }

</bundles_post_ra>
